<compile_context>
chip_gen: v5e
topology: v5e:2x2
jax: 0.10.0
libtpu: 0.0.40
codegen_flags: <defaults>
</compile_context>

<pallas_src>
import jax
import jax.numpy as jnp
from jax.experimental import pallas as pl
from jax.experimental.pallas import tpu as pltpu


_LANE = 128                # lane-dense slab width (multiple of 128 -> unmasked stores)
_PALLAS_MIN_ELEMS = 65536  # below this, pallas_call launch overhead dominates -> plain JAX


def _affine_kernel(x_ref, w_ref, b_ref, o_ref):
    # x_ref / o_ref: (tile_rows, 128) f32 in VMEM
    # w_ref: (1,) f32 in SMEM      b_ref: (1,) f32 in SMEM
    w = w_ref[0]          # hoisted scalar reads; broadcast FMA runs on the VPU
    b = b_ref[0]
    o_ref[...] = x_ref[...] * w + b


def _round_up(n, m):
    return ((n + m - 1) // m) * m


def _default_tile_rows():
    """Per-generation tile: 8192 rows (4 MiB) on v6e/v7x, 4096 (2 MiB) otherwise.

    4096-row tiles keep x+out double-buffering at 8 MiB, inside v5e's 16 MiB
    default scoped VMEM; v6e/v7x (32 MiB scoped) comfortably fit 8192.
    """
    try:
        kind = jax.devices()[0].device_kind.lower()
    except Exception:
        return 4096
    if ("v6" in kind) or ("v7" in kind):
        return 8192
    return 4096


def linear_regression_forward(x, weight, bias, *, tile_rows=None):
    """Forward pass equivalent to torch nn.Linear(1, 1)(x).

    x:      (..., 1) float32
    weight: (1, 1)   float32  (PyTorch layout: [out_features, in_features])
    bias:   (1,)     float32
    returns same shape as x.
    """
    orig_shape = x.shape
    assert orig_shape[-1] == 1 and weight.shape == (1, 1) and bias.shape == (1,)

    x = x.astype(jnp.float32)
    w_flat = weight.astype(jnp.float32).reshape(1)   # (1,) avoids padded 2D SMEM slab
    b_flat = bias.astype(jnp.float32).reshape(1)

    n = x.size
    # Plain-JAX fallback whenever the Pallas path would add any extra HBM
    # traffic (padding / strip-slice) or launch overhead would dominate.
    if n < _PALLAS_MIN_ELEMS or n % _LANE != 0:
        return (x * w_flat[0] + b_flat[0]).reshape(orig_shape)

    if tile_rows is None:
        tile_rows = _default_tile_rows()
    assert tile_rows % 8 == 0 and tile_rows >= 8

    # --- lane-dense slab: free reshape to (rows, 128), no padding ------------
    rows = n // _LANE
    tr = min(tile_rows, _round_up(rows, 8))          # don't over-tile small inputs
    grid = (pl.cdiv(rows, tr),)                      # ragged final block handled by Pallas
    slab = x.reshape(rows, _LANE)

    out_slab = pl.pallas_call(
        _affine_kernel,
        out_shape=jax.ShapeDtypeStruct((rows, _LANE), jnp.float32),
        grid=grid,
        in_specs=[
            pl.BlockSpec((tr, _LANE), lambda i: (i, 0)),            # x tile (VMEM)
            pl.BlockSpec(memory_space=pltpu.MemorySpace.SMEM),      # weight scalar
            pl.BlockSpec(memory_space=pltpu.MemorySpace.SMEM),      # bias scalar
        ],
        out_specs=pl.BlockSpec((tr, _LANE), lambda i: (i, 0)),
        compiler_params=pltpu.CompilerParams(
            dimension_semantics=("parallel",),   # lets v7x shard tiles across its 2 TCs
        ),
        cost_estimate=pl.CostEstimate(
            flops=2 * n, transcendentals=0, bytes_accessed=8 * n),
    )(slab, w_flat, b_flat)

    # rows * 128 == n, so this reshape is free (no strip-slice / extra HBM pass).
    return out_slab.reshape(orig_shape)


if __name__ == "__main__":
    key = jax.random.PRNGKey(0)
    kx1, kx2, kx3, kw, kb = jax.random.split(key, 5)

    # Deterministic parameters (in_features=1 -> nn.Linear bound = 1/sqrt(1) = 1).
    weight = jax.random.uniform(kw, (1, 1), dtype=jnp.float32, minval=-1.0, maxval=1.0)
    bias = jax.random.uniform(kb, (1,), dtype=jnp.float32, minval=-1.0, maxval=1.0)

    # Case 1: tiny batch (B=8) -> plain-JAX fallback path (launch overhead > work).
    x_small = jax.random.normal(kx1, (8, 1), dtype=jnp.float32)
    y_small = jax.block_until_ready(linear_regression_forward(x_small, weight, bias))
    ref_small = x_small @ weight.T + bias
    assert y_small.shape == x_small.shape
    assert jnp.allclose(y_small, ref_small, atol=1e-6)

    # Case 2: lane-aligned batch exercising the gridded Pallas path.
    # B = 131072 -> rows = 1024; tile_rows=128 gives a ragged-free 8-step grid
    # while keeping the test allocation small (512 KiB).
    B = 131072
    x_big = jax.random.normal(kx2, (B, 1), dtype=jnp.float32)
    y_big = jax.block_until_ready(
        linear_regression_forward(x_big, weight, bias, tile_rows=128))
    ref_big = x_big @ weight.T + bias
    assert y_big.shape == x_big.shape
    assert jnp.allclose(y_big, ref_big, atol=1e-6)

    # Case 3: unaligned batch (B % 128 != 0) -> plain-JAX path, no padding pass.
    x_odd = jax.random.normal(kx3, (1000, 1), dtype=jnp.float32)
    y_odd = jax.block_until_ready(linear_regression_forward(x_odd, weight, bias))
    ref_odd = x_odd @ weight.T + bias
    assert y_odd.shape == x_odd.shape
    assert jnp.allclose(y_odd, ref_odd, atol=1e-6)

    print("KERNEL_OK")
</pallas_src>

<mosaic_0001>
module attributes {stable_mosaic.version = 11 : i64} {
  func.func @_affine_kernel(%arg0: i32, %arg1: memref<128x128xf32, #tpu.memory_space<vmem>>, %arg2: memref<1xf32, #tpu.memory_space<smem>>, %arg3: memref<1xf32, #tpu.memory_space<smem>>, %arg4: memref<128x128xf32, #tpu.memory_space<vmem>>) attributes {dimension_semantics = [#tpu.dimension_semantics<parallel>], iteration_bounds = array<i64: 8>, scalar_prefetch = 0 : i64, scratch_operands = 0 : i64, tpu.core_type = #tpu.core_type<tc>, window_params = [{transform_indices = @transform_0, window_bounds = array<i64: 128, 128>}, {transform_indices = @transform_1, window_bounds = array<i64: 1>}, {transform_indices = @transform_2, window_bounds = array<i64: 1>}, {transform_indices = @transform_3, window_bounds = array<i64: 128, 128>}]} {
    %c0 = arith.constant 0 : index
    %0 = memref.load %arg2[%c0] : memref<1xf32, #tpu.memory_space<smem>>
    %c0_0 = arith.constant 0 : index
    %1 = memref.load %arg3[%c0_0] : memref<1xf32, #tpu.memory_space<smem>>
    %c0_1 = arith.constant 0 : index
    %c0_2 = arith.constant 0 : index
    %2 = vector.load %arg1[%c0_1, %c0_2] : memref<128x128xf32, #tpu.memory_space<vmem>>, vector<128x128xf32>
    %3 = vector.broadcast %0 : f32 to vector<128x128xf32>
    %4 = arith.mulf %2, %3 : vector<128x128xf32>
    %5 = vector.broadcast %1 : f32 to vector<128x128xf32>
    %6 = arith.addf %4, %5 : vector<128x128xf32>
    %c0_3 = arith.constant 0 : index
    %c0_4 = arith.constant 0 : index
    %7 = vector.load %arg4[%c0_3, %c0_4] : memref<128x128xf32, #tpu.memory_space<vmem>>, vector<128x128xf32>
    tpu.vector_store %arg4[%c0_3, %c0_4], %6 {strides = array<i32>} : memref<128x128xf32, #tpu.memory_space<vmem>>, vector<128x128xf32>,
    return
  }
  func.func @transform_0(%arg0: i32) -> (i32, i32) {
    %c0_i32 = arith.constant 0 : i32
    %c0_i32_0 = arith.constant 0 : i32
    return %arg0, %c0_i32 : i32, i32
  }
  func.func @transform_1(%arg0: i32) -> i32 {
    %c0_i32 = arith.constant 0 : i32
    %c0_i32_0 = arith.constant 0 : i32
    return %c0_i32 : i32
  }
  func.func @transform_2(%arg0: i32) -> i32 {
    %c0_i32 = arith.constant 0 : i32
    %c0_i32_0 = arith.constant 0 : i32
    return %c0_i32 : i32
  }
  func.func @transform_3(%arg0: i32) -> (i32, i32) {
    %c0_i32 = arith.constant 0 : i32
    %c0_i32_0 = arith.constant 0 : i32
    return %arg0, %c0_i32 : i32, i32
  }
}

</mosaic_0001>

<bundles_post_ra>
// kernel: tpu_custom_call.1
= control target key start
LH: loop header
LB: loop body
LE: loop exit
PB: predicated region body
PF: predicated region fallthrough
CT: control target
= control target key end

     0   :  { %s712_s0 = inlined_call_operand.hbm [shape: f32[1024,128], index: 0, kind: input, shape index: {}]   ;;  %s713_s1 = inlined_call_operand.<no memory space> [shape: f32[1], index: 1, kind: input, shape index: {}]   ;;  %s714_s2 = inlined_call_operand.<no memory space> [shape: f32[1], index: 2, kind: input, shape index: {}]   ;;  %s715_s3 = inlined_call_operand.hbm [shape: f32[1024,128], index: 3, kind: output, shape index: {}]  }
   0x1   :  { %8 = sst [smem:[#allocation2]] %s713_s1 }
   0x2   :  { %9 = sst [smem:[#allocation3]] %s714_s2 }
   0x3   :  { %10 = vsyncpa [#allocation5], 0 }
   0x4   :  { %12 = vsyncpa [#allocation5 + $0x1], 0 }
   0x5   :  { %13 = vsyncpa [#allocation6], 0 }
   0x6   :  { %15 = vsyncpa [#allocation6 + $0x1], 0  ;;  %s546_s16 = smov 0   ;;  %s548_s17 = smov 0  }
   0x7   :  { %s550_s18 = smov 0   ;;  %s552_s19 = smov 0  }
   0x8 LB: > { %s567_s1 = sadd.s32 4294967295, %s514_s19   ;;  %s352_s2 = sadd.s32 4294967294, %s514_s19   ;;  %s514_s19 = sphi %s552_s19, %s724_s19   ;;  %s510_s18 = sphi %s550_s18, %s723_s18   ;;  %s506_s17 = sphi %s548_s17, %s722_s17   ;;  %s502_s16 = sphi %s546_s16, %s721_s16  }
   0x9   : > { %s571_s20 = sadd.s32 1, %s514_s19   ;;  %s28_s21 = sadd.s32 1, %s510_s18 }
   0xa   : > { %s25_s22 = ssub.s32 %s514_s19, %s571_s20  ;;  %p35_p0 = scmp.ne.s32.totalorder %s510_s18, %s506_s17 }
   0xb   : > { %p26_p1 = scmp.eq.s32.totalorder %s25_s22, 0  ;;  %p36_p2 = scmp.eq.s32.totalorder %s514_s19, 0 }
   0xc   : > { %p41_p3 = scmp.ne.s32.totalorder %s506_s17, %s502_s16  ;;  %p42_p4 = scmp.eq.s32.totalorder %s567_s1, 0 }
   0xd   : > { %s583_s23 = scalar_select %p26_p1, %s510_s18, %s28_s21  }
   0xe   : > { %p585_p5 = por %p36_p2, %p35_p0  ;;  %p589_p6 = por %p42_p4, %p41_p3 }
   0xf   : > { %p107_p7 = scmp.eq.s32.totalorder %s567_s1, 7  ;;  %p113_p8 = scmp.eq.s32.totalorder %s352_s2, 7 }
  0x10   : > { %p380_p9 = scmp.lt.s32.totalorder %s514_s19, 8  ;;  %s139_s28 = sand.u32 1, %s510_s18  }
  0x11   : > { %p595_p10 = por %p107_p7, %p35_p0  ;;  %p599_p11 = por %p113_p8, %p41_p3 }
  0x12   : > { %s366_s29 = sshll.u32 %s514_s19, 7  ;;  %s355_s30 = sshll.u32 %s139_s28, 7 }
  0x13   : > { %s148_s6 = scalar_lea.hbm %s712_s0, %s366_s29  ;;  %s143_s8 = scalar_lea.vmem [#allocation4], %s355_s30 }
  0x14   : > { %s149_s7 = sshll.u32 %s148_s6, 4  ;;  %s151_s9 = sshll.u32 %s143_s8, 4  ;;  %s150_s7 = int_to_ptr.hbm [resolvable:$true] %s149_s7  ;;  %s152_s9 = int_to_ptr.vmem [resolvable:$true] %s151_s9 }
  0x15   : > { %p610_p12 = pnand %p380_p9, %p585_p5  ;;  %p358_p13 = scmp.ge.s32.totalorder %s514_s19, 1 }
  0x16   : > { %p159_p0 = scmp.lt.s32.totalorder %s514_s19, 9  ;;  %s140_s11 = scalar_lea.sflag [#allocation5], %s139_s28 }
  0x17   : > { %s418_s12 = sshra.s32 %s150_s7, 4  ;;  %p422_p2 = pneg %p610_p12  ;;  %s419_s12 = int_to_ptr.hbm [resolvable:$true] %s418_s12 }
  0x18   : > { %s420_s13 = scalar_lea.hbm %s419_s12, 128  ;;  %s425_s2 = scalar_lea.hbm %s712_s0, 1024 }
  0x19   : > { %p421_p1 = scmp.ne.s32.totalorder %s419_s12, %s420_s13  ;;  %p426_p5 = scmp.lt.s32.totalorder %s419_s12, %s712_s0 }
  0x1a   : > { %p427_p7 = scmp.lt.s32.totalorder %s425_s2, %s420_s13 }
  0x1b   : > { %p423_p3 = pnand %p422_p2, %p421_p1 }
  0x1c   : > { %p428_p8 = por %p427_p7, %p426_p5 }
  0x1d   : > { %p424_p4 = pneg %p423_p3 }
  0x1f   : > { %p429_p9 = pnand %p428_p8, %p424_p4 }
  0x21   : > { %432 = shalt.err (!%p429_p9)
}
  0x22   : > { %s516_s24 = smov 128   ;;  %s517_s28 = smov 8  }
  0x23   : > { %375 = dma.hbm_to_vmem [thread:$0]  (!%p610_p12), %s150_s7, 2048, %s152_s9, %s140_s11, %s516_s24, %s516_s24, %s517_s28  }
  0x24   : > { %p160_p1 = pnand %p358_p13, %p159_p0 }
  0x25   : > { %s631_s29 = sand.u32 (!%p160_p1), 1, %s506_s17  }
  0x26   : > { %163 = sbr.rel (%p160_p1) target bundleno = 74 (0x4a), region = 32  ;;  %s359_s30 = sshll.u32 (!%p160_p1), %s631_s29, 7 }
  0x27   : > { %s166_s4 = scalar_lea.sflag (!%p160_p1), [#allocation5], %s631_s29  ;;  %s637_s5 = scalar_lea.vmem (!%p160_p1), [#allocation4], %s359_s30 }
  0x2b   : > { %493 = dma.done.wait (%p589_p6), %s166_s4, 2048  }
  0x2c   : > { %495 = vsyncadd (%p589_p6), %s166_s4, 4294965248  ;;  %s195_s6 = sld [smem:[#allocation2]]  ;;  %v197_v0 = vld [vmem:[%s637_s5] sm:$0xff]  ;;  %v198_v2 = vld [vmem:[%s637_s5 + $0x8] sm:$0xff]  ;;  %s656_s25 = scalar_lea.vmem [#allocation7], %s359_s30 }
  0x2d   : > { %s196_s7 = sld [smem:[#allocation3]]  ;;  %v199_v3 = vld [vmem:[%s637_s5 + $0x10] sm:$0xff]  ;;  %v200_v8 = vld [vmem:[%s637_s5 + $0x18] sm:$0xff]  ;;  %v201_v9 = vld [vmem:[%s637_s5 + $0x20] sm:$0xff]  ;;  %s367_s8 = sshll.u32 %s567_s1, 7 }
  0x2e   : > { %v202_v10 = vld [vmem:[%s637_s5 + $0x28] sm:$0xff]  ;;  %v203_v14 = vld [vmem:[%s637_s5 + $0x30] sm:$0xff]  ;;  %v204_v15 = vld [vmem:[%s637_s5 + $0x38] sm:$0xff]  ;;  %s275_s11 = scalar_lea.hbm %s715_s3, %s367_s8  ;;  %s276_s1 = sshll.u32 %s656_s25, 4  ;;  %s277_s1 = int_to_ptr.vmem [resolvable:$true] %s276_s1 }
  0x2f   : > { %v205_v16 = vld [vmem:[%s637_s5 + $0x40] sm:$0xff]  ;;  %v206_v21 = vld [vmem:[%s637_s5 + $0x48] sm:$0xff]  ;;  %v207_v24 = vld [vmem:[%s637_s5 + $0x50] sm:$0xff]  ;;  %s278_s12 = sshll.u32 %s275_s11, 4  ;;  %s264_s13 = scalar_lea.sflag [#allocation6], %s631_s29  ;;  %s279_s12 = int_to_ptr.hbm [resolvable:$true] %s278_s12 }
  0x30   : > { %v208_v27 = vld [vmem:[%s637_s5 + $0x58] sm:$0xff]  ;;  %v209_v30 = vld [vmem:[%s637_s5 + $0x60] sm:$0xff]  ;;  %v210_v33 = vld [vmem:[%s637_s5 + $0x68] sm:$0xff]  ;;  %s462_s14 = sshra.s32 %s279_s12, 4  ;;  %s468_s22 = scalar_lea.hbm %s715_s3, 1024  ;;  %s463_s14 = int_to_ptr.hbm [resolvable:$true] %s462_s14 }
  0x31   : > { %v211_v36 = vld [vmem:[%s637_s5 + $0x70] sm:$0xff]  ;;  %v212_v39 = vld [vmem:[%s637_s5 + $0x78] sm:$0xff]  ;;  %s464_s15 = scalar_lea.hbm %s463_s14, 128  ;;  %p469_p0 = scmp.lt.s32.totalorder %s463_s14, %s715_s3 }
  0x32   : > { %v213_v1 = vstv %s195_s6  ;;  %p465_p6 = scmp.ne.s32.totalorder %s463_s14, %s464_s15  ;;  %p470_p2 = scmp.lt.s32.totalorder %s468_s22, %s464_s15 }
  0x33   : > { %v214_v4 = vmul.f32 %v213_v1, %v197_v0  ;;  %v230_v5 = vstv %s196_s7  ;;  %v215_v6 = vmul.f32 %v213_v1, %v198_v2  ;;  %v216_v7 = vmul.f32 %v213_v1, %v199_v3 }
  0x34   : > { %v217_v11 = vmul.f32 %v213_v1, %v200_v8  ;;  %v218_v12 = vmul.f32 %v213_v1, %v201_v9  ;;  %v219_v13 = vmul.f32 %v213_v1, %v202_v10  ;;  %v220_v20 = vmul.f32 %v213_v1, %v203_v14  ;;  %p466_p12 = pnand %p465_p6, %p595_p10  ;;  %p471_p3 = por %p470_p2, %p469_p0 }
  0x35   : > { %v231_v17 = vadd.f32 %v230_v5, %v214_v4  ;;  %v232_v18 = vadd.f32 %v230_v5, %v215_v6  ;;  %v233_v19 = vadd.f32 %v230_v5, %v216_v7  ;;  %v221_v23 = vmul.f32 %v213_v1, %v204_v15 }
  0x36   : > { %v234_v22 = vadd.f32 %v230_v5, %v217_v11  ;;  %v235_v25 = vadd.f32 %v230_v5, %v218_v12  ;;  %v222_v26 = vmul.f32 %v213_v1, %v205_v16  ;;  %v236_v28 = vadd.f32 %v230_v5, %v219_v13  ;;  %p467_p13 = pneg %p466_p12 }
  0x37   : > { %247 = vst [vmem:[%s656_s25] sm:$0xff] %v231_v17  ;;  %v223_v29 = vmul.f32 %v213_v1, %v206_v21  ;;  %v237_v31 = vadd.f32 %v230_v5, %v220_v20  ;;  %v224_v32 = vmul.f32 %v213_v1, %v207_v24  ;;  %v238_v34 = vadd.f32 %v230_v5, %v221_v23 }
  0x38   : > { %248 = vst [vmem:[%s656_s25 + $0x8] sm:$0xff] %v232_v18  ;;  %v225_v35 = vmul.f32 %v213_v1, %v208_v27  ;;  %v239_v37 = vadd.f32 %v230_v5, %v222_v26  ;;  %v226_v38 = vmul.f32 %v213_v1, %v209_v30  ;;  %v227_v41 = vmul.f32 %v213_v1, %v210_v33  ;;  %p472_p4 = pnand %p471_p3, %p467_p13 }
  0x39   : > { %249 = vst [vmem:[%s656_s25 + $0x10] sm:$0xff] %v233_v19  ;;  %v240_v40 = vadd.f32 %v230_v5, %v223_v29  ;;  %v241_v42 = vadd.f32 %v230_v5, %v224_v32  ;;  %v228_v43 = vmul.f32 %v213_v1, %v211_v36  ;;  %v229_v45 = vmul.f32 %v213_v1, %v212_v39 }
  0x3a   : > { %250 = vst [vmem:[%s656_s25 + $0x18] sm:$0xff] %v234_v22  ;;  %v242_v44 = vadd.f32 %v230_v5, %v225_v35  ;;  %v243_v46 = vadd.f32 %v230_v5, %v226_v38  ;;  %v244_v47 = vadd.f32 %v230_v5, %v227_v41 }
  0x3b   : > { %251 = vst [vmem:[%s656_s25 + $0x20] sm:$0xff] %v235_v25  ;;  %v245_v48 = vadd.f32 %v230_v5, %v228_v43  ;;  %v246_v49 = vadd.f32 %v230_v5, %v229_v45 }
  0x3c   : > { %252 = vst [vmem:[%s656_s25 + $0x28] sm:$0xff] %v236_v28 }
  0x3d   : > { %253 = vst [vmem:[%s656_s25 + $0x30] sm:$0xff] %v237_v31 }
  0x3e   : > { %254 = vst [vmem:[%s656_s25 + $0x38] sm:$0xff] %v238_v34 }
  0x3f   : > { %255 = vst [vmem:[%s656_s25 + $0x40] sm:$0xff] %v239_v37 }
  0x40   : > { %256 = vst [vmem:[%s656_s25 + $0x48] sm:$0xff] %v240_v40 }
  0x41   : > { %257 = vst [vmem:[%s656_s25 + $0x50] sm:$0xff] %v241_v42 }
  0x42   : > { %258 = vst [vmem:[%s656_s25 + $0x58] sm:$0xff] %v242_v44 }
  0x43   : > { %259 = vst [vmem:[%s656_s25 + $0x60] sm:$0xff] %v243_v46 }
  0x44   : > { %260 = vst [vmem:[%s656_s25 + $0x68] sm:$0xff] %v244_v47 }
  0x45   : > { %261 = vst [vmem:[%s656_s25 + $0x70] sm:$0xff] %v245_v48 }
  0x46   : > { %262 = vst [vmem:[%s656_s25 + $0x78] sm:$0xff] %v246_v49 }
  0x47   : > { %475 = shalt.err (!%p472_p4)
}
  0x48   : > { %s518_s29 = smov 128   ;;  %s519_s30 = smov 8  }
  0x49   : > { %370 = dma.vmem_to_hbm [thread:$0]  (%p595_p10), %s277_s1, 2048, %s279_s12, %s264_s13, %s518_s29, %s518_s29, %s519_s30  }
  0x4a PF: > { %p381_p5 = scmp.ge.s32.totalorder %s514_s19, 2  ;;  %s293_s4 = sand.u32 1, %s502_s16  }
  0x4b   : > { %s294_s5 = scalar_lea.sflag [#allocation6], %s293_s4 }
  0x4c   : > { %p377_p7 = pnand %p381_p5, %p599_p11 }
  0x4e   : > { %p378_p8 = pneg %p377_p7 }
  0x50   : > { %497 = dma.done.wait (%p378_p8), %s294_s5, 2048  }
  0x51   : > { %499 = vsyncadd (%p378_p8), %s294_s5, 4294965248  ;;  %p18_p9 = scmp.ge.s32.totalorder %s571_s20, 10   ;;  %s721_s16 = smov %s506_s17 }
  0x52   : > { %s722_s17 = smov %s510_s18  ;;  %s723_s18 = smov %s583_s23 }
  0x53   : > { %s724_s19 = smov %s571_s20  ;;  %20 = sbr.rel (!%p18_p9) target bundleno = 8 (0x8), region = 77 }
  0x58   :  { %300 = vsyncpa [#allocation5], 1 }
  0x59   :  { %302 = vsyncpa [#allocation5 + $0x1], 1 }
  0x5a   :  { %303 = vsyncpa [#allocation6], 1 }
  0x5b   :  { %305 = vsyncpa [#allocation6 + $0x1], 1 }

</bundles_post_ra>
